<compile_context>
chip_gen: v7x
topology: tpu7x:2x2x1
jax: 0.10.0
libtpu: 0.0.40
codegen_flags: <defaults>
</compile_context>

<pallas_src>
import functools
from itertools import combinations

import jax
import jax.numpy as jnp
import numpy as np
from jax.experimental import pallas as pl
from jax.experimental.pallas import tpu as pltpu

# ----- configuration matching QuantumAutoencoder.__init__ -------------------
N_QUBITS = 8          # measurements are hard-coded on wires 6 and 7 -> need >= 8 wires
N_LAYERS = 4
N_TRASH = 2
NOISE = None          # TODO(synk): PennyLane noise models (default.mixed density matrices) have no Pallas equivalent
DIM = 2 ** N_QUBITS   # 256 amplitudes
N_MEAS = 9
OUT_LANES = 16        # small output slab; sliced to N_MEAS in the wrapper
MAX_BATCH_BLOCK = 1024  # batch rows per grid step


# ------------------------- host-side matrix construction --------------------
def _ry(theta):
    c, s = np.cos(theta / 2.0), np.sin(theta / 2.0)
    return np.array([[c, -s], [s, c]], dtype=np.float64)


def _kron_all(mats):
    out = mats[0]
    for m in mats[1:]:
        out = np.kron(out, m)
    return out


def _cz_pairs(n_qubits, n_trash):
    pairs = list(combinations(range(n_trash), 2))
    for idx in range(n_trash):
        for i in range(n_trash):
            for j in range(n_trash + i, n_qubits, n_trash):
                pairs.append(((idx + i) % n_trash, j))
    return pairs


def _cz_diag(pairs, n_qubits):
    idx = np.arange(2 ** n_qubits)
    d = np.ones(2 ** n_qubits, dtype=np.float64)
    for a, b in pairs:
        ma = 1 << (n_qubits - 1 - a)
        mb = 1 << (n_qubits - 1 - b)
        both = ((idx & ma) != 0) & ((idx & mb) != 0)
        d = d * np.where(both, -1.0, 1.0)
    return d


def build_qae_constants(weights, n_qubits=N_QUBITS, n_layers=N_LAYERS, n_trash=N_TRASH):
    """Compose the ENTIRE circuit in float64 on the host and quantize once.

    Row-vector convention: psi_out = psi_in @ U^T, and (psi @ U_T) * cz == psi @ (U_T * cz),
    so each CZ diagonal is folded into the columns of its layer matrix before composing.
    The composed matrix is then concatenated with its XOR-1/2/3 column permutations
    (X on wire 7, wire 6, both): psi_final[i ^ m] == (psi @ comp[:, idx ^ m])[i].
    Returns a single bf16 (dim, 4*dim) matrix (~512 KiB resident on chip).
    """
    w = np.asarray(weights, dtype=np.float64)
    dim = 2 ** n_qubits
    cz = _cz_diag(_cz_pairs(n_qubits, n_trash), n_qubits)

    comp = np.eye(dim, dtype=np.float64)
    end = 0
    for l in range(n_layers - 1):
        start, end = l * n_qubits, (l + 1) * n_qubits
        u_t = _kron_all([_ry(w[start + i]) for i in range(n_qubits)]).T
        comp = comp @ (u_t * cz[None, :])                         # fold CZ into columns

    mats = [_ry(w[end + i]) for i in range(n_trash)] + [np.eye(2)] * (n_qubits - n_trash)
    comp = comp @ _kron_all(mats).T                               # last layer (trash-wire RYs)

    idx = np.arange(dim)
    w_big = np.concatenate(
        [comp, comp[:, idx ^ 1], comp[:, idx ^ 2], comp[:, idx ^ 3]], axis=1)  # (dim, 4*dim)
    return jnp.asarray(w_big.astype(np.float32)).astype(jnp.bfloat16)


# ------------------------------- Pallas kernel -------------------------------
def qae_kernel(x_ref, w_ref, o_ref, *, dim, out_lanes):
    x = x_ref[...].astype(jnp.float32)                                   # (bb, dim)
    # AmplitudeEmbedding(normalize=True). Exact zero-norm guard: all-zero rows (incl.
    # batch padding) give zero outputs; any nonzero row is normalized exactly.
    norm_sq = jnp.sum(x * x, axis=-1, keepdims=True)
    psi = x * jax.lax.rsqrt(jnp.where(norm_sq > 0.0, norm_sq, 1.0))

    # ONE fused matmul for the whole circuit: bf16 x bf16 operands, f32 accumulation.
    # Columns 0..dim-1 are the final state; the next 3 blocks are its XOR-1/2/3 lane
    # permutations (X on wire 7 / wire 6 / both).
    big = jnp.dot(psi.astype(jnp.bfloat16), w_ref[...],
                  preferred_element_type=jnp.float32)                    # (bb, 4*dim) f32
    psi_f = big[:, 0 * dim:1 * dim]
    v_x7  = big[:, 1 * dim:2 * dim]        # psi_f[i ^ 1]
    v_x6  = big[:, 2 * dim:3 * dim]        # psi_f[i ^ 2]
    v_xx  = big[:, 3 * dim:4 * dim]        # psi_f[i ^ 3]

    # +/-1 Pauli-Z diagonals for wire 7 (bit 0) and wire 6 (bit 1), built from an iota.
    lane = jax.lax.broadcasted_iota(jnp.int32, (1, dim), 1)
    z7 = jnp.where(jnp.bitwise_and(lane, 1) == 0, 1.0, -1.0).astype(jnp.float32)
    z6 = jnp.where(jnp.bitwise_and(lane, 2) == 0, 1.0, -1.0).astype(jnp.float32)
    zz = z6 * z7

    p2 = psi_f * psi_f
    e_x6 = jnp.sum(psi_f * v_x6, axis=-1, keepdims=True)
    e_z6 = jnp.sum(p2 * z6, axis=-1, keepdims=True)
    e_x7 = jnp.sum(psi_f * v_x7, axis=-1, keepdims=True)
    e_z7 = jnp.sum(p2 * z7, axis=-1, keepdims=True)
    e_xx = jnp.sum(psi_f * v_xx, axis=-1, keepdims=True)
    e_yy = -jnp.sum(psi_f * zz * v_xx, axis=-1, keepdims=True)
    e_zz = jnp.sum(p2 * zz, axis=-1, keepdims=True)
    # <Y6> = <Y7> = 0 exactly for a real state -> columns 1 and 4 stay zero (no work).

    # (bb, 16) output; order [X6, Y6, Z6, X7, Y7, Z7, XX, YY, ZZ] in lanes 0..8.
    bb = psi_f.shape[0]
    col = jax.lax.broadcasted_iota(jnp.int32, (bb, out_lanes), 1)
    out = jnp.zeros((bb, out_lanes), jnp.float32)
    for k, e in ((0, e_x6), (2, e_z6), (3, e_x7), (5, e_z7), (6, e_xx), (7, e_yy), (8, e_zz)):
        out = jnp.where(col == k, e, out)
    o_ref[...] = out


# --------------------------------- wrapper -----------------------------------
def _round_up(n, m):
    return ((n + m - 1) // m) * m


@jax.jit
def quantum_autoencoder_forward(x, w_big_bf16):
    """Jittable forward: x (B, C, H, W) with C*H*W == 2**N_QUBITS -> (B, 9) expectations."""
    b = x.shape[0]
    x_flat = jnp.reshape(x, (b, DIM)).astype(jnp.float32)

    # Pad the batch to a sublane multiple; force >= 2 grid steps when possible so the
    # "parallel" batch axis shards across both v7x TensorCores (harmless on v5e/v6e).
    bb = _round_up(max(b, 1), 8)
    if bb >= 16:
        block_b = min(MAX_BATCH_BLOCK, _round_up(-(-bb // 2), 8))
    else:
        block_b = bb
    bb = _round_up(bb, block_b)
    if bb != b:
        x_flat = jnp.pad(x_flat, ((0, bb - b), (0, 0)))

    kernel = functools.partial(qae_kernel, dim=DIM, out_lanes=OUT_LANES)
    out = pl.pallas_call(
        kernel,
        out_shape=jax.ShapeDtypeStruct((bb, OUT_LANES), jnp.float32),
        grid=(bb // block_b,),
        in_specs=[
            pl.BlockSpec((block_b, DIM), lambda i: (i, 0)),
            # constant index map -> the single bf16 circuit matrix stays resident across tiles
            pl.BlockSpec((DIM, 4 * DIM), lambda i: (0, 0)),
        ],
        out_specs=pl.BlockSpec((block_b, OUT_LANES), lambda i: (i, 0)),
        compiler_params=pltpu.CompilerParams(
            dimension_semantics=("parallel",),   # batch axis is embarrassingly parallel
        ),
    )(x_flat, w_big_bf16)
    return out[:b, :N_MEAS]


# -------------------- host reference (gate-by-gate statevector) --------------
def build_observables(n_qubits):
    """Dense observables, used ONLY by the host reference (independent of kernel structure)."""
    I2 = np.eye(2, dtype=np.complex128)
    X = np.array([[0, 1], [1, 0]], dtype=np.complex128)
    Y = np.array([[0, -1j], [1j, 0]], dtype=np.complex128)
    Z = np.array([[1, 0], [0, -1]], dtype=np.complex128)

    def full(ops):
        mats = [ops.get(wi, I2) for wi in range(n_qubits)]
        # statevector is real throughout (RY/CZ only): <psi|P|psi> = psi^T Re(P) psi
        return np.real(_kron_all(mats))

    obs = [full({6: X}), full({6: Y}), full({6: Z}),
           full({7: X}), full({7: Y}), full({7: Z}),
           full({6: X, 7: X}), full({6: Y, 7: Y}), full({6: Z, 7: Z})]
    return np.stack(obs).astype(np.float64)


def _apply_ry(psi, theta, wire, n_qubits):
    c, s = np.cos(theta / 2.0), np.sin(theta / 2.0)
    a = psi.reshape((2 ** wire, 2, 2 ** (n_qubits - 1 - wire)))
    s0, s1 = a[:, 0, :].copy(), a[:, 1, :].copy()
    out = np.empty_like(a)
    out[:, 0, :] = c * s0 - s * s1
    out[:, 1, :] = s * s0 + c * s1
    return out.reshape(-1)


def _apply_cz(psi, a, b, n_qubits):
    idx = np.arange(psi.size)
    ma = 1 << (n_qubits - 1 - a)
    mb = 1 << (n_qubits - 1 - b)
    sign = np.where(((idx & ma) != 0) & ((idx & mb) != 0), -1.0, 1.0)
    return psi * sign


def reference_forward(x, weights, n_qubits, n_layers, n_trash):
    xn = np.asarray(x, dtype=np.float64).reshape(x.shape[0], -1)
    w = np.asarray(weights, dtype=np.float64)
    p = build_observables(n_qubits)
    cz_pairs = _cz_pairs(n_qubits, n_trash)
    outs = []
    for row in xn:
        psi = row / np.linalg.norm(row)
        end = 0
        for l in range(n_layers - 1):
            start, end = l * n_qubits, (l + 1) * n_qubits
            for q in range(n_qubits):
                psi = _apply_ry(psi, w[start + q], q, n_qubits)
            for a, b in cz_pairs:
                psi = _apply_cz(psi, a, b, n_qubits)
        for i in range(n_trash):
            psi = _apply_ry(psi, w[end + i], i, n_qubits)
        outs.append([psi @ p[k] @ psi for k in range(N_MEAS)])
    return np.array(outs)


# ------------------------------------ main ------------------------------------
if __name__ == "__main__":
    key = jax.random.PRNGKey(0)
    k_w, k_x = jax.random.split(key)

    n_weights = N_LAYERS * N_QUBITS - (N_QUBITS - N_TRASH)      # 26 for (4, 8, 2)
    quantum_weights = jax.random.normal(k_w, (n_weights,), dtype=jnp.float32)

    # NCHW input: 4 * 8 * 8 = 256 = 2**N_QUBITS amplitudes per sample
    x = jax.random.normal(k_x, (2, 4, 8, 8), dtype=jnp.float32)

    # Circuit constant built once on the host, reused by every (jitted) forward call.
    w_big_bf16 = build_qae_constants(quantum_weights)

    out = quantum_autoencoder_forward(x, w_big_bf16)
    out = jax.block_until_ready(out)

    ref = reference_forward(x, quantum_weights, N_QUBITS, N_LAYERS, N_TRASH)
    assert out.shape == (2, N_MEAS)
    # tolerance accounts for the single bf16 quantization of the composed circuit matrix
    # and the bf16 cast of psi at the MXU input
    np.testing.assert_allclose(np.asarray(out), ref, atol=2e-2, rtol=2e-2)

    print("KERNEL_OK")
</pallas_src>

<mosaic_0001>
module attributes {stable_mosaic.version = 11 : i64} {
  func.func @qae_kernel(%arg0: i32, %arg1: memref<8x256xf32, #tpu.memory_space<vmem>>, %arg2: memref<256x1024xbf16, #tpu.memory_space<vmem>>, %arg3: memref<8x16xf32, #tpu.memory_space<vmem>>) attributes {dimension_semantics = [#tpu.dimension_semantics<parallel>], iteration_bounds = array<i64: 1>, scalar_prefetch = 0 : i64, scratch_operands = 0 : i64, tpu.core_type = #tpu.core_type<tc>, window_params = [{transform_indices = @transform_0, window_bounds = array<i64: 8, 256>}, {pipeline_mode = #tpu.pipeline_mode<synchronous>, transform_indices = @transform_1, window_bounds = array<i64: 256, 1024>}, {transform_indices = @transform_2, window_bounds = array<i64: 8, 16>}]} {
    %c0 = arith.constant 0 : index
    %c0_0 = arith.constant 0 : index
    %0 = vector.load %arg1[%c0, %c0_0] : memref<8x256xf32, #tpu.memory_space<vmem>>, vector<8x256xf32>
    %1 = arith.mulf %0, %0 : vector<8x256xf32>
    %cst = arith.constant dense<0.000000e+00> : vector<8xf32>
    %2 = vector.multi_reduction <add>, %1, %cst [1] : vector<8x256xf32> to vector<8xf32>
    %3 = vector.shape_cast %2 : vector<8xf32> to vector<8x1xf32>
    %cst_1 = arith.constant 0.000000e+00 : f32
    %4 = vector.broadcast %cst_1 : f32 to vector<8x1xf32>
    %5 = arith.cmpf ogt, %3, %4 : vector<8x1xf32>
    %cst_2 = arith.constant 1.000000e+00 : f32
    %6 = vector.broadcast %cst_2 : f32 to vector<8x1xf32>
    %7 = arith.select %5, %3, %6 : vector<8x1xi1>, vector<8x1xf32>
    %8 = math.rsqrt %7 : vector<8x1xf32>
    %9 = vector.broadcast %8 : vector<8x1xf32> to vector<8x256xf32>
    %10 = arith.mulf %0, %9 : vector<8x256xf32>
    %11 = arith.truncf %10 : vector<8x256xf32> to vector<8x256xbf16>
    %c0_3 = arith.constant 0 : index
    %c0_4 = arith.constant 0 : index
    %12 = vector.load %arg2[%c0_3, %c0_4] : memref<256x1024xbf16, #tpu.memory_space<vmem>>, vector<256x1024xbf16>
    %cst_5 = arith.constant dense<0.000000e+00> : vector<8x1024xf32>
    %13 = tpu.matmul %11, %12, %cst_5 {dimension_numbers = #tpu.dot_dimension_numbers<[1], [0], [0], [1], [0, 0, 1, 1], [], []>} : vector<8x256xbf16>, vector<256x1024xbf16>, vector<8x1024xf32> -> vector<8x1024xf32>
    %14 = vector.extract_strided_slice %13 {offsets = [0, 0], sizes = [8, 256], strides = [1, 1]} : vector<8x1024xf32> to vector<8x256xf32>
    %15 = vector.extract_strided_slice %13 {offsets = [0, 256], sizes = [8, 256], strides = [1, 1]} : vector<8x1024xf32> to vector<8x256xf32>
    %16 = vector.extract_strided_slice %13 {offsets = [0, 512], sizes = [8, 256], strides = [1, 1]} : vector<8x1024xf32> to vector<8x256xf32>
    %17 = vector.extract_strided_slice %13 {offsets = [0, 768], sizes = [8, 256], strides = [1, 1]} : vector<8x1024xf32> to vector<8x256xf32>
    %18 = tpu.iota {dimensions = array<i32: 1>} : vector<1x256xi32>
    %c1_i32 = arith.constant 1 : i32
    %19 = vector.broadcast %c1_i32 : i32 to vector<1x256xi32>
    %20 = arith.andi %18, %19 : vector<1x256xi32>
    %c0_i32 = arith.constant 0 : i32
    %21 = vector.broadcast %c0_i32 : i32 to vector<1x256xi32>
    %22 = arith.cmpi eq, %20, %21 : vector<1x256xi32>
    %cst_6 = arith.constant 1.000000e+00 : f32
    %cst_7 = arith.constant -1.000000e+00 : f32
    %23 = vector.broadcast %cst_6 : f32 to vector<1x256xf32>
    %24 = vector.broadcast %cst_7 : f32 to vector<1x256xf32>
    %25 = arith.select %22, %23, %24 : vector<1x256xi1>, vector<1x256xf32>
    %c2_i32 = arith.constant 2 : i32
    %26 = vector.broadcast %c2_i32 : i32 to vector<1x256xi32>
    %27 = arith.andi %18, %26 : vector<1x256xi32>
    %c0_i32_8 = arith.constant 0 : i32
    %28 = vector.broadcast %c0_i32_8 : i32 to vector<1x256xi32>
    %29 = arith.cmpi eq, %27, %28 : vector<1x256xi32>
    %cst_9 = arith.constant 1.000000e+00 : f32
    %cst_10 = arith.constant -1.000000e+00 : f32
    %30 = vector.broadcast %cst_9 : f32 to vector<1x256xf32>
    %31 = vector.broadcast %cst_10 : f32 to vector<1x256xf32>
    %32 = arith.select %29, %30, %31 : vector<1x256xi1>, vector<1x256xf32>
    %33 = arith.mulf %32, %25 : vector<1x256xf32>
    %34 = arith.mulf %14, %14 : vector<8x256xf32>
    %35 = arith.mulf %14, %16 : vector<8x256xf32>
    %cst_11 = arith.constant dense<0.000000e+00> : vector<8xf32>
    %36 = vector.multi_reduction <add>, %35, %cst_11 [1] : vector<8x256xf32> to vector<8xf32>
    %37 = vector.shape_cast %36 : vector<8xf32> to vector<8x1xf32>
    %38 = vector.broadcast %32 : vector<1x256xf32> to vector<8x256xf32>
    %39 = arith.mulf %34, %38 : vector<8x256xf32>
    %cst_12 = arith.constant dense<0.000000e+00> : vector<8xf32>
    %40 = vector.multi_reduction <add>, %39, %cst_12 [1] : vector<8x256xf32> to vector<8xf32>
    %41 = vector.shape_cast %40 : vector<8xf32> to vector<8x1xf32>
    %42 = arith.mulf %14, %15 : vector<8x256xf32>
    %cst_13 = arith.constant dense<0.000000e+00> : vector<8xf32>
    %43 = vector.multi_reduction <add>, %42, %cst_13 [1] : vector<8x256xf32> to vector<8xf32>
    %44 = vector.shape_cast %43 : vector<8xf32> to vector<8x1xf32>
    %45 = vector.broadcast %25 : vector<1x256xf32> to vector<8x256xf32>
    %46 = arith.mulf %34, %45 : vector<8x256xf32>
    %cst_14 = arith.constant dense<0.000000e+00> : vector<8xf32>
    %47 = vector.multi_reduction <add>, %46, %cst_14 [1] : vector<8x256xf32> to vector<8xf32>
    %48 = vector.shape_cast %47 : vector<8xf32> to vector<8x1xf32>
    %49 = arith.mulf %14, %17 : vector<8x256xf32>
    %cst_15 = arith.constant dense<0.000000e+00> : vector<8xf32>
    %50 = vector.multi_reduction <add>, %49, %cst_15 [1] : vector<8x256xf32> to vector<8xf32>
    %51 = vector.shape_cast %50 : vector<8xf32> to vector<8x1xf32>
    %52 = vector.broadcast %33 : vector<1x256xf32> to vector<8x256xf32>
    %53 = arith.mulf %14, %52 : vector<8x256xf32>
    %54 = arith.mulf %53, %17 : vector<8x256xf32>
    %cst_16 = arith.constant dense<0.000000e+00> : vector<8xf32>
    %55 = vector.multi_reduction <add>, %54, %cst_16 [1] : vector<8x256xf32> to vector<8xf32>
    %56 = vector.shape_cast %55 : vector<8xf32> to vector<8x1xf32>
    %cst_17 = arith.constant 0.000000e+00 : f32
    %57 = vector.broadcast %cst_17 : f32 to vector<8x1xf32>
    %58 = arith.subf %57, %56 : vector<8x1xf32>
    %59 = vector.broadcast %33 : vector<1x256xf32> to vector<8x256xf32>
    %60 = arith.mulf %34, %59 : vector<8x256xf32>
    %cst_18 = arith.constant dense<0.000000e+00> : vector<8xf32>
    %61 = vector.multi_reduction <add>, %60, %cst_18 [1] : vector<8x256xf32> to vector<8xf32>
    %62 = vector.shape_cast %61 : vector<8xf32> to vector<8x1xf32>
    %63 = tpu.iota {dimensions = array<i32: 1>} : vector<8x16xi32>
    %cst_19 = arith.constant 0.000000e+00 : f32
    %64 = vector.broadcast %cst_19 : f32 to vector<8x16xf32>
    %c0_i32_20 = arith.constant 0 : i32
    %65 = vector.broadcast %c0_i32_20 : i32 to vector<8x16xi32>
    %66 = arith.cmpi eq, %63, %65 : vector<8x16xi32>
    %67 = vector.shape_cast %37 : vector<8x1xf32> to vector<8x1xf32>
    %68 = vector.broadcast %67 : vector<8x1xf32> to vector<8x16xf32>
    %69 = arith.select %66, %68, %64 : vector<8x16xi1>, vector<8x16xf32>
    %c2_i32_21 = arith.constant 2 : i32
    %70 = vector.broadcast %c2_i32_21 : i32 to vector<8x16xi32>
    %71 = arith.cmpi eq, %63, %70 : vector<8x16xi32>
    %72 = vector.shape_cast %41 : vector<8x1xf32> to vector<8x1xf32>
    %73 = vector.broadcast %72 : vector<8x1xf32> to vector<8x16xf32>
    %74 = arith.select %71, %73, %69 : vector<8x16xi1>, vector<8x16xf32>
    %c3_i32 = arith.constant 3 : i32
    %75 = vector.broadcast %c3_i32 : i32 to vector<8x16xi32>
    %76 = arith.cmpi eq, %63, %75 : vector<8x16xi32>
    %77 = vector.shape_cast %44 : vector<8x1xf32> to vector<8x1xf32>
    %78 = vector.broadcast %77 : vector<8x1xf32> to vector<8x16xf32>
    %79 = arith.select %76, %78, %74 : vector<8x16xi1>, vector<8x16xf32>
    %c5_i32 = arith.constant 5 : i32
    %80 = vector.broadcast %c5_i32 : i32 to vector<8x16xi32>
    %81 = arith.cmpi eq, %63, %80 : vector<8x16xi32>
    %82 = vector.shape_cast %48 : vector<8x1xf32> to vector<8x1xf32>
    %83 = vector.broadcast %82 : vector<8x1xf32> to vector<8x16xf32>
    %84 = arith.select %81, %83, %79 : vector<8x16xi1>, vector<8x16xf32>
    %c6_i32 = arith.constant 6 : i32
    %85 = vector.broadcast %c6_i32 : i32 to vector<8x16xi32>
    %86 = arith.cmpi eq, %63, %85 : vector<8x16xi32>
    %87 = vector.shape_cast %51 : vector<8x1xf32> to vector<8x1xf32>
    %88 = vector.broadcast %87 : vector<8x1xf32> to vector<8x16xf32>
    %89 = arith.select %86, %88, %84 : vector<8x16xi1>, vector<8x16xf32>
    %c7_i32 = arith.constant 7 : i32
    %90 = vector.broadcast %c7_i32 : i32 to vector<8x16xi32>
    %91 = arith.cmpi eq, %63, %90 : vector<8x16xi32>
    %92 = vector.shape_cast %58 : vector<8x1xf32> to vector<8x1xf32>
    %93 = vector.broadcast %92 : vector<8x1xf32> to vector<8x16xf32>
    %94 = arith.select %91, %93, %89 : vector<8x16xi1>, vector<8x16xf32>
    %c8_i32 = arith.constant 8 : i32
    %95 = vector.broadcast %c8_i32 : i32 to vector<8x16xi32>
    %96 = arith.cmpi eq, %63, %95 : vector<8x16xi32>
    %97 = vector.shape_cast %62 : vector<8x1xf32> to vector<8x1xf32>
    %98 = vector.broadcast %97 : vector<8x1xf32> to vector<8x16xf32>
    %99 = arith.select %96, %98, %94 : vector<8x16xi1>, vector<8x16xf32>
    %c0_22 = arith.constant 0 : index
    %c0_23 = arith.constant 0 : index
    %100 = vector.load %arg3[%c0_22, %c0_23] : memref<8x16xf32, #tpu.memory_space<vmem>>, vector<8x16xf32>
    tpu.vector_store %arg3[%c0_22, %c0_23], %99 {strides = array<i32>} : memref<8x16xf32, #tpu.memory_space<vmem>>, vector<8x16xf32>,
    return
  }
  func.func @transform_0(%arg0: i32) -> (i32, i32) {
    %c0_i32 = arith.constant 0 : i32
    %c0_i32_0 = arith.constant 0 : i32
    return %arg0, %c0_i32 : i32, i32
  }
  func.func @transform_1(%arg0: i32) -> (i32, i32) {
    %c0_i32 = arith.constant 0 : i32
    %c0_i32_0 = arith.constant 0 : i32
    %c0_i32_1 = arith.constant 0 : i32
    return %c0_i32, %c0_i32_0 : i32, i32
  }
  func.func @transform_2(%arg0: i32) -> (i32, i32) {
    %c0_i32 = arith.constant 0 : i32
    %c0_i32_0 = arith.constant 0 : i32
    return %arg0, %c0_i32 : i32, i32
  }
}

</mosaic_0001>

<bundles_post_ra>
// kernel: quantum_autoencoder_forward.1
= control target key start
LH: loop header
LB: loop body
LE: loop exit
PB: predicated region body
PF: predicated region fallthrough
CT: control target
= control target key end

     0   :  { %7 = vsyncpa [#allocation3], 0  ;;  %s1207_s9 = smov [#allocation2]   ;;  %s1297_s0 = inlined_call_operand.vmem [shape: f32[8,256], index: 0, kind: input, shape index: {}]   ;;  %s1298_s1 = inlined_call_operand.hbm [shape: bf16[256,1024], index: 1, kind: input, shape index: {}]   ;;  %s1299_s2 = inlined_call_operand.vmem [shape: f32[8,16], index: 2, kind: output, shape index: {}]  }
   0x1   :  { %s15_s10 = sshll.u32 %s1207_s9, 4  ;;  %s1183_s13 = scalar_lea.hbm %s1298_s1, 16384  ;;  %s16_s10 = int_to_ptr.vmem [resolvable:$true] %s15_s10 }
   0x2   :  { %p1184_p0 = scmp.ne.s32.totalorder %s1298_s1, %s1183_s13  ;;  %p1187_p1 = scmp.lt.u32.totalorder %s1183_s13, %s1298_s1 }
   0x4   :  { %p1189_p2 = pnand %p1187_p1, %p1184_p0 }
   0x6   :  { %1192 = shalt.err (!%p1189_p2)
}
   0x7   :  { %s1193_s18 = scalar_lea.vmem %s16_s10, 16384  ;;  %p1198_p4 = scmp.lt.s32.totalorder %s16_s10, %s16_s10 }
   0x8   :  { %p1194_p3 = scmp.ne.s32.totalorder %s16_s10, %s1193_s18  ;;  %p1199_p5 = scmp.lt.s32.totalorder %s1193_s18, %s1193_s18 }
   0xa   :  { %p1200_p6 = por %p1199_p5, %p1198_p4 }
   0xc   :  { %p1201_p7 = pnand %p1200_p6, %p1194_p3 }
   0xe   :  { %1204 = shalt.err (!%p1201_p7)
}
   0xf   :  { %s1208_s19 = smov 512   ;;  %s1209_s20 = smov 32  }
  0x10   :  { %21 = dma.hbm_to_vmem [thread:$0]  %s1298_s1, 16384, %s16_s10, [#allocation3], %s1208_s19, %s1208_s19, %s1209_s20  }
  0x11   :  { %1205 = dma.done.wait [#allocation3], 16384  }
  0x12   :  { %1206 = vsyncadd [#allocation3], 4294950912  ;;  %v1241_v0 = vld [vmem:[%s1297_s0] sm:$0xff]  ;;  %v1246_v1 = vld [vmem:[%s1297_s0 + $0x8] sm:$0xff]  ;;  %vm1042_vm12 = vcmask 130048  }
  0x13   :  { %v39_v2 = vld [vmem:[#allocation2] sm:$0xff]  ;;  %v27_v3 = vmul.f32 %v1241_v0, %v1241_v0  ;;  %v28_v4 = vmul.f32 %v1246_v1, %v1246_v1  ;;  %v40_v6 = vld [vmem:[#allocation2 + $0x8] sm:$0xff] }
  0x14   :  { %v43_v5 = vld [vmem:[#allocation2 + $0x20] sm:$0xff]  ;;  %v44_v7 = vld [vmem:[#allocation2 + $0x28] sm:$0xff] }
  0x15   :  { %v1050_v8 = vcombine.high %v39_v2, %v43_v5  ;;  %v1052_v9 = vcombine.high %v40_v6, %v44_v7  ;;  %v1049_v10 = vcombine.low %v39_v2, %v43_v5  ;;  %v1051_v11 = vcombine.low %v40_v6, %v44_v7  ;;  %v47_v12 = vld [vmem:[#allocation2 + $0x40] sm:$0xff]  ;;  %v48_v14 = vld [vmem:[#allocation2 + $0x48] sm:$0xff] }
  0x16   :  { %v51_v13 = vld [vmem:[#allocation2 + $0x60] sm:$0xff]  ;;  %v29_v15 = vadd.f32 %v28_v4, %v27_v3  ;;  %v52_v17 = vld [vmem:[#allocation2 + $0x68] sm:$0xff] }
  0x17   :  { %v1058_v16 = vcombine.high %v47_v12, %v51_v13  ;;  %v55_v18 = vld [vmem:[#allocation2 + $0x80] sm:$0xff]  ;;  %807 = vmatprep.subr.bf16.mxu0 %v1050_v8  ;;  %848 = vmatprep.subr.bf16.mxu1 %v1052_v9  ;;  %v1060_v20 = vcombine.high %v48_v14, %v52_v17  ;;  %v56_v21 = vld [vmem:[#allocation2 + $0x88] sm:$0xff]  ;;  %v1057_v23 = vcombine.low %v47_v12, %v51_v13 }
  0x18   :  { %v59_v19 = vld [vmem:[#allocation2 + $0xa0] sm:$0xff]  ;;  %v60_v22 = vld [vmem:[#allocation2 + $0xa8] sm:$0xff]  ;;  %30 = vadd.xlane.f32.xlu0 %v29_v15  ;;  %808 = vmatpush1.bf16.msra.mxu0 %v1049_v10  ;;  %v1059_v24 = vcombine.low %v48_v14, %v52_v17 }
  0x19   :  { %849 = vmatpush1.bf16.msra.mxu1 %v1051_v11  ;;  %809 = vmatprep.subr.bf16.mxu0 %v1058_v16  ;;  %v1066_v25 = vcombine.high %v55_v18, %v59_v19  ;;  %v1068_v26 = vcombine.high %v56_v21, %v60_v22  ;;  %v63_v27 = vld [vmem:[#allocation2 + $0xc0] sm:$0xff]  ;;  %v64_v29 = vld [vmem:[#allocation2 + $0xc8] sm:$0xff]  ;;  %v1065_v31 = vcombine.low %v55_v18, %v59_v19  ;;  %v1252_v18 = vld [vmem:[#allocation2 + $0x10] sm:$0xff] }
  0x1a   :  { %850 = vmatprep.subr.bf16.mxu1 %v1060_v20  ;;  %v67_v28 = vld [vmem:[#allocation2 + $0xe0] sm:$0xff]  ;;  %v68_v30 = vld [vmem:[#allocation2 + $0xe8] sm:$0xff]  ;;  %v1067_v32 = vcombine.low %v56_v21, %v60_v22  ;;  %v1254_v19 = vld [vmem:[#allocation2 + $0x30] sm:$0xff] }
  0x1b   :  { %v1074_v33 = vcombine.high %v63_v27, %v67_v28  ;;  %v1076_v34 = vcombine.high %v64_v29, %v68_v30  ;;  %v71_v35 = vld [vmem:[#allocation2 + $0x100] sm:$0xff]  ;;  %v72_v37 = vld [vmem:[#allocation2 + $0x108] sm:$0xff]  ;;  %v1073_v39 = vcombine.low %v63_v27, %v67_v28  ;;  %v1075_v40 = vcombine.low %v64_v29, %v68_v30  ;;  %v1256_v20 = vld [vmem:[#allocation2 + $0x18] sm:$0xff] }
  0x1c   :  { %810 = vmatpush1.bf16.msra.mxu0 %v1057_v23  ;;  %v75_v36 = vld [vmem:[#allocation2 + $0x120] sm:$0xff]  ;;  %v76_v38 = vld [vmem:[#allocation2 + $0x128] sm:$0xff]  ;;  %v1258_v23 = vld [vmem:[#allocation2 + $0x38] sm:$0xff]  ;;  %v1053_v27 = vcombine.low %v1252_v18, %v1254_v19 }
  0x1d   :  { %851 = vmatpush1.bf16.msra.mxu1 %v1059_v24  ;;  %811 = vmatprep.subr.bf16.mxu0 %v1066_v25  ;;  %v1082_v41 = vcombine.high %v71_v35, %v75_v36  ;;  %v1084_v42 = vcombine.high %v72_v37, %v76_v38  ;;  %v79_v43 = vld [vmem:[#allocation2 + $0x140] sm:$0xff]  ;;  %v80_v45 = vld [vmem:[#allocation2 + $0x148] sm:$0xff]  ;;  %v1081_v47 = vcombine.low %v71_v35, %v75_v36 }
  0x1e   :  { %852 = vmatprep.subr.bf16.mxu1 %v1068_v26  ;;  %v83_v44 = vld [vmem:[#allocation2 + $0x160] sm:$0xff]  ;;  %v84_v46 = vld [vmem:[#allocation2 + $0x168] sm:$0xff]  ;;  %v1083_v48 = vcombine.low %v72_v37, %v76_v38  ;;  %v1055_v28 = vcombine.low %v1256_v20, %v1258_v23 }
  0x1f   :  { %v1090_v49 = vcombine.high %v79_v43, %v83_v44  ;;  %v1092_v50 = vcombine.high %v80_v45, %v84_v46  ;;  %v87_v51 = vld [vmem:[#allocation2 + $0x180] sm:$0xff]  ;;  %v88_v53 = vld [vmem:[#allocation2 + $0x188] sm:$0xff]  ;;  %v1089_v55 = vcombine.low %v79_v43, %v83_v44  ;;  %v1091_v56 = vcombine.low %v80_v45, %v84_v46 }
  0x20   :  { %812 = vmatpush1.bf16.msra.mxu0 %v1065_v31  ;;  %v91_v52 = vld [vmem:[#allocation2 + $0x1a0] sm:$0xff]  ;;  %v92_v54 = vld [vmem:[#allocation2 + $0x1a8] sm:$0xff] }
  0x21   :  { %853 = vmatpush1.bf16.msra.mxu1 %v1067_v32  ;;  %813 = vmatprep.subr.bf16.mxu0 %v1074_v33  ;;  %v1098_v57 = vcombine.high %v87_v51, %v91_v52  ;;  %v1100_v58 = vcombine.high %v88_v53, %v92_v54  ;;  %v95_v59 = vld [vmem:[#allocation2 + $0x1c0] sm:$0xff]  ;;  %v96_v61 = vld [vmem:[#allocation2 + $0x1c8] sm:$0xff]  ;;  %v1097_v63 = vcombine.low %v87_v51, %v91_v52 }
  0x22   :  { %854 = vmatprep.subr.bf16.mxu1 %v1076_v34  ;;  %v99_v60 = vld [vmem:[#allocation2 + $0x1e0] sm:$0xff]  ;;  %v100_v62 = vld [vmem:[#allocation2 + $0x1e8] sm:$0xff]  ;;  %v1099_v2 = vcombine.low %v88_v53, %v92_v54 }
  0x23   :  { %v1106_v3 = vcombine.high %v95_v59, %v99_v60  ;;  %v1108_v4 = vcombine.high %v96_v61, %v100_v62  ;;  %v103_v5 = vld [vmem:[#allocation2 + $0x200] sm:$0xff]  ;;  %v104_v7 = vld [vmem:[#allocation2 + $0x208] sm:$0xff]  ;;  %v1105_v9 = vcombine.low %v95_v59, %v99_v60  ;;  %v1107_v10 = vcombine.low %v96_v61, %v100_v62 }
  0x24   :  { %814 = vmatpush1.bf16.msra.mxu0 %v1073_v39  ;;  %v107_v6 = vld [vmem:[#allocation2 + $0x220] sm:$0xff]  ;;  %v108_v8 = vld [vmem:[#allocation2 + $0x228] sm:$0xff] }
  0x25   :  { %855 = vmatpush1.bf16.msra.mxu1 %v1075_v40  ;;  %815 = vmatprep.subr.bf16.mxu0 %v1082_v41  ;;  %v1114_v11 = vcombine.high %v103_v5, %v107_v6  ;;  %v1116_v12 = vcombine.high %v104_v7, %v108_v8  ;;  %v111_v13 = vld [vmem:[#allocation2 + $0x240] sm:$0xff]  ;;  %v112_v15 = vld [vmem:[#allocation2 + $0x248] sm:$0xff]  ;;  %v1113_v17 = vcombine.low %v103_v5, %v107_v6 }
  0x26   :  { %856 = vmatprep.subr.bf16.mxu1 %v1084_v42  ;;  %v115_v14 = vld [vmem:[#allocation2 + $0x260] sm:$0xff]  ;;  %v116_v16 = vld [vmem:[#allocation2 + $0x268] sm:$0xff]  ;;  %v1115_v21 = vcombine.low %v104_v7, %v108_v8 }
  0x27   :  { %v1122_v22 = vcombine.high %v111_v13, %v115_v14  ;;  %v1124_v24 = vcombine.high %v112_v15, %v116_v16  ;;  %v119_v25 = vld [vmem:[#allocation2 + $0x280] sm:$0xff]  ;;  %v120_v29 = vld [vmem:[#allocation2 + $0x288] sm:$0xff]  ;;  %v1121_v31 = vcombine.low %v111_v13, %v115_v14  ;;  %v1123_v32 = vcombine.low %v112_v15, %v116_v16 }
  0x28   :  { %816 = vmatpush1.bf16.msra.mxu0 %v1081_v47  ;;  %v123_v26 = vld [vmem:[#allocation2 + $0x2a0] sm:$0xff]  ;;  %v124_v30 = vld [vmem:[#allocation2 + $0x2a8] sm:$0xff]  ;;  %v1054_v15 = vcombine.high %v1252_v18, %v1254_v19  ;;  %v1056_v16 = vcombine.high %v1256_v20, %v1258_v23 }
  0x29   :  { %857 = vmatpush1.bf16.msra.mxu1 %v1083_v48  ;;  %817 = vmatprep.subr.bf16.mxu0 %v1090_v49  ;;  %v1130_v33 = vcombine.high %v119_v25, %v123_v26  ;;  %v1132_v34 = vcombine.high %v120_v29, %v124_v30  ;;  %v127_v35 = vld [vmem:[#allocation2 + $0x2c0] sm:$0xff]  ;;  %v128_v37 = vld [vmem:[#allocation2 + $0x2c8] sm:$0xff]  ;;  %v1129_v39 = vcombine.low %v119_v25, %v123_v26  ;;  %v49_v26 = vld [vmem:[#allocation2 + $0x50] sm:$0xff] }
  0x2a   :  { %858 = vmatprep.subr.bf16.mxu1 %v1092_v50  ;;  %v131_v36 = vld [vmem:[#allocation2 + $0x2e0] sm:$0xff]  ;;  %v132_v38 = vld [vmem:[#allocation2 + $0x2e8] sm:$0xff]  ;;  %v1131_v40 = vcombine.low %v120_v29, %v124_v30  ;;  %v53_v29 = vld [vmem:[#allocation2 + $0x70] sm:$0xff] }
  0x2b   :  { %v1138_v41 = vcombine.high %v127_v35, %v131_v36  ;;  %v1140_v42 = vcombine.high %v128_v37, %v132_v38  ;;  %v135_v43 = vld [vmem:[#allocation2 + $0x300] sm:$0xff]  ;;  %v136_v45 = vld [vmem:[#allocation2 + $0x308] sm:$0xff]  ;;  %v1137_v47 = vcombine.low %v127_v35, %v131_v36  ;;  %v1139_v48 = vcombine.low %v128_v37, %v132_v38  ;;  %v50_v30 = vld [vmem:[#allocation2 + $0x58] sm:$0xff] }
  0x2c   :  { %818 = vmatpush1.bf16.msra.mxu0 %v1089_v55  ;;  %v139_v44 = vld [vmem:[#allocation2 + $0x320] sm:$0xff]  ;;  %v140_v46 = vld [vmem:[#allocation2 + $0x328] sm:$0xff]  ;;  %v1062_v35 = vcombine.high %v49_v26, %v53_v29  ;;  %v61_v37 = vld [vmem:[#allocation2 + $0xb0] sm:$0xff] }
  0x2d   :  { %859 = vmatpush1.bf16.msra.mxu1 %v1091_v56  ;;  %819 = vmatprep.subr.bf16.mxu0 %v1098_v57  ;;  %v1146_v49 = vcombine.high %v135_v43, %v139_v44  ;;  %v1148_v50 = vcombine.high %v136_v45, %v140_v46  ;;  %v143_v51 = vld [vmem:[#allocation2 + $0x340] sm:$0xff]  ;;  %v144_v53 = vld [vmem:[#allocation2 + $0x348] sm:$0xff]  ;;  %v1145_v55 = vcombine.low %v135_v43, %v139_v44  ;;  %v58_v38 = vld [vmem:[#allocation2 + $0x98] sm:$0xff] }
  0x2e   :  { %860 = vmatprep.subr.bf16.mxu1 %v1100_v58  ;;  %v147_v52 = vld [vmem:[#allocation2 + $0x360] sm:$0xff]  ;;  %v148_v54 = vld [vmem:[#allocation2 + $0x368] sm:$0xff]  ;;  %v1147_v56 = vcombine.low %v136_v45, %v140_v46  ;;  %v69_v43 = vld [vmem:[#allocation2 + $0xf0] sm:$0xff] }
  0x2f   :  { %v1154_v57 = vcombine.high %v143_v51, %v147_v52  ;;  %v1156_v58 = vcombine.high %v144_v53, %v148_v54  ;;  %v151_v59 = vld [vmem:[#allocation2 + $0x380] sm:$0xff]  ;;  %v152_v61 = vld [vmem:[#allocation2 + $0x388] sm:$0xff]  ;;  %v66_v44 = vld [vmem:[#allocation2 + $0xd8] sm:$0xff] }
  0x30   :  { %820 = vmatpush1.bf16.msra.mxu0 %v1097_v63  ;;  %v155_v60 = vld [vmem:[#allocation2 + $0x3a0] sm:$0xff]  ;;  %v156_v62 = vld [vmem:[#allocation2 + $0x3a8] sm:$0xff]  ;;  %v1153_v63 = vcombine.low %v143_v51, %v147_v52  ;;  %v70_v45 = vld [vmem:[#allocation2 + $0xf8] sm:$0xff] }
  0x31   :  { %861 = vmatpush1.bf16.msra.mxu1 %v1099_v2  ;;  %821 = vmatprep.subr.bf16.mxu0 %v1106_v3  ;;  %v1155_v2 = vcombine.low %v144_v53, %v148_v54  ;;  %v1162_v3 = vcombine.high %v151_v59, %v155_v60  ;;  %v159_v5 = vld [vmem:[#allocation2 + $0x3c0] sm:$0xff]  ;;  %v160_v7 = vld [vmem:[#allocation2 + $0x3c8] sm:$0xff]  ;;  %v1080_v23 = vcombine.high %v66_v44, %v70_v45  ;;  %v74_v46 = vld [vmem:[#allocation2 + $0x118] sm:$0xff] }
  0x32   :  { %862 = vmatprep.subr.bf16.mxu1 %v1108_v4  ;;  %v1164_v4 = vcombine.high %v152_v61, %v156_v62  ;;  %v163_v6 = vld [vmem:[#allocation2 + $0x3e0] sm:$0xff]  ;;  %v164_v8 = vld [vmem:[#allocation2 + $0x3e8] sm:$0xff]  ;;  %v81_v52 = vld [vmem:[#allocation2 + $0x150] sm:$0xff] }
  0x33   :  { %v1169_v13 = vcombine.low %v159_v5, %v163_v6  ;;  %v1171_v14 = vcombine.low %v160_v7, %v164_v8  ;;  %v85_v53 = vld [vmem:[#allocation2 + $0x170] sm:$0xff]  ;;  %v82_v54 = vld [vmem:[#allocation2 + $0x158] sm:$0xff] }
  0x34   :  { %822 = vmatpush1.bf16.msra.mxu0 %v1105_v9  ;;  %v1161_v9 = vcombine.low %v151_v59, %v155_v60  ;;  %v89_v60 = vld [vmem:[#allocation2 + $0x190] sm:$0xff] }
  0x35   :  { %863 = vmatpush1.bf16.msra.mxu1 %v1107_v10  ;;  %823 = vmatprep.subr.bf16.mxu0 %v1114_v11  ;;  %v1163_v10 = vcombine.low %v152_v61, %v156_v62  ;;  %v1170_v11 = vcombine.high %v159_v5, %v163_v6  ;;  %v93_v61 = vld [vmem:[#allocation2 + $0x1b0] sm:$0xff]  ;;  %v90_v62 = vld [vmem:[#allocation2 + $0x198] sm:$0xff] }
  0x36   :  { %864 = vmatprep.subr.bf16.mxu1 %v1116_v12  ;;  %v1172_v12 = vcombine.high %v160_v7, %v164_v8  ;;  %v97_v6 = vld [vmem:[#allocation2 + $0x1d0] sm:$0xff]  ;;  %v98_v8 = vld [vmem:[#allocation2 + $0x1d8] sm:$0xff] }
  0x37   :  { %v101_v7 = vld [vmem:[#allocation2 + $0x1f0] sm:$0xff] }
  0x38   :  { %824 = vmatpush1.bf16.msra.mxu0 %v1113_v17 }
  0x39   :  { %865 = vmatpush1.bf16.msra.mxu1 %v1115_v21  ;;  %825 = vmatprep.subr.bf16.mxu0 %v1122_v22 }
  0x3a   :  { %866 = vmatprep.subr.bf16.mxu1 %v1124_v24 }
  0x3c   :  { %826 = vmatpush1.bf16.msra.mxu0 %v1121_v31  ;;  %v54_v31 = vld [vmem:[#allocation2 + $0x78] sm:$0xff] }
  0x3d   :  { %867 = vmatpush1.bf16.msra.mxu1 %v1123_v32  ;;  %827 = vmatprep.subr.bf16.mxu0 %v1130_v33  ;;  %v1064_v36 = vcombine.high %v50_v30, %v54_v31 }
  0x3e   :  { %868 = vmatprep.subr.bf16.mxu1 %v1132_v34  ;;  %v57_v34 = vld [vmem:[#allocation2 + $0x90] sm:$0xff] }
  0x3f   :  { %v1069_v18 = vcombine.low %v57_v34, %v61_v37 }
  0x40   :  { %828 = vmatpush1.bf16.msra.mxu0 %v1129_v39  ;;  %v62_v39 = vld [vmem:[#allocation2 + $0xb8] sm:$0xff] }
  0x41   :  { %869 = vmatpush1.bf16.msra.mxu1 %v1131_v40  ;;  %829 = vmatprep.subr.bf16.mxu0 %v1138_v41  ;;  %v1070_v40 = vcombine.high %v57_v34, %v61_v37  ;;  %v1072_v41 = vcombine.high %v58_v38, %v62_v39  ;;  %v1071_v19 = vcombine.low %v58_v38, %v62_v39  ;;  %v121_v37 = vld [vmem:[#allocation2 + $0x290] sm:$0xff]  ;;  %v122_v39 = vld [vmem:[#allocation2 + $0x298] sm:$0xff] }
  0x42   :  { %870 = vmatprep.subr.bf16.mxu1 %v1140_v42  ;;  %v65_v42 = vld [vmem:[#allocation2 + $0xd0] sm:$0xff] }
  0x43   :  { %v1078_v20 = vcombine.high %v65_v42, %v69_v43  ;;  %v125_v38 = vld [vmem:[#allocation2 + $0x2b0] sm:$0xff] }
  0x44   :  { %830 = vmatpush1.bf16.msra.mxu0 %v1137_v47  ;;  %v78_v47 = vld [vmem:[#allocation2 + $0x138] sm:$0xff] }
  0x45   :  { %871 = vmatpush1.bf16.msra.mxu1 %v1139_v48  ;;  %831 = vmatprep.subr.bf16.mxu0 %v1146_v49  ;;  %v1077_v48 = vcombine.low %v65_v42, %v69_v43  ;;  %v1079_v49 = vcombine.low %v66_v44, %v70_v45  ;;  %v1088_v51 = vcombine.high %v74_v46, %v78_v47  ;;  %v129_v43 = vld [vmem:[#allocation2 + $0x2d0] sm:$0xff]  ;;  %v130_v45 = vld [vmem:[#allocation2 + $0x2d8] sm:$0xff] }
  0x46   :  { %872 = vmatprep.subr.bf16.mxu1 %v1148_v50  ;;  %v133_v44 = vld [vmem:[#allocation2 + $0x2f0] sm:$0xff] }
  0x48   :  { %832 = vmatpush1.bf16.msra.mxu0 %v1145_v55  ;;  %v86_v55 = vld [vmem:[#allocation2 + $0x178] sm:$0xff] }
  0x49   :  { %873 = vmatpush1.bf16.msra.mxu1 %v1147_v56  ;;  %833 = vmatprep.subr.bf16.mxu0 %v1154_v57  ;;  %v1087_v57 = vcombine.low %v74_v46, %v78_v47  ;;  %v1096_v59 = vcombine.high %v82_v54, %v86_v55  ;;  %v141_v46 = vld [vmem:[#allocation2 + $0x330] sm:$0xff]  ;;  %v138_v47 = vld [vmem:[#allocation2 + $0x318] sm:$0xff] }
  0x4a   :  { %874 = vmatprep.subr.bf16.mxu1 %v1156_v58  ;;  %v1094_v58 = vcombine.high %v81_v52, %v85_v53 }
  0x4c   :  { %834 = vmatpush1.bf16.msra.mxu0 %v1153_v63  ;;  %v94_v63 = vld [vmem:[#allocation2 + $0x1b8] sm:$0xff] }
  0x4d   :  { %875 = vmatpush1.bf16.msra.mxu1 %v1155_v2  ;;  %835 = vmatprep.subr.bf16.mxu0 %v1162_v3  ;;  %v1093_v2 = vcombine.low %v81_v52, %v85_v53  ;;  %v1095_v3 = vcombine.low %v82_v54, %v86_v55  ;;  %v1104_v5 = vcombine.high %v90_v62, %v94_v63  ;;  %v145_v53 = vld [vmem:[#allocation2 + $0x350] sm:$0xff]  ;;  %v146_v55 = vld [vmem:[#allocation2 + $0x358] sm:$0xff] }
  0x4e   :  { %876 = vmatprep.subr.bf16.mxu1 %v1164_v4  ;;  %v1102_v4 = vcombine.high %v89_v60, %v93_v61  ;;  %v149_v54 = vld [vmem:[#allocation2 + $0x370] sm:$0xff] }
  0x50   :  { %836 = vmatpush1.bf16.msra.mxu0 %v1161_v9  ;;  %v102_v9 = vld [vmem:[#allocation2 + $0x1f8] sm:$0xff] }
  0x51   :  { %877 = vmatpush1.bf16.msra.mxu1 %v1163_v10  ;;  %837 = vmatprep.subr.bf16.mxu0 %v1170_v11  ;;  %v1101_v10 = vcombine.low %v89_v60, %v93_v61  ;;  %v1103_v11 = vcombine.low %v90_v62, %v94_v63  ;;  %v153_v61 = vld [vmem:[#allocation2 + $0x390] sm:$0xff]  ;;  %v154_v63 = vld [vmem:[#allocation2 + $0x398] sm:$0xff] }
  0x52   :  { %878 = vmatprep.subr.bf16.mxu1 %v1172_v12  ;;  %v1110_v12 = vcombine.high %v97_v6, %v101_v7  ;;  %v157_v62 = vld [vmem:[#allocation2 + $0x3b0] sm:$0xff] }
  0x54   :  { %838 = vmatpush1.bf16.msra.mxu0 %v1169_v13  ;;  %v1112_v13 = vcombine.high %v98_v8, %v102_v9 }
  0x55   :  { %879 = vmatpush1.bf16.msra.mxu1 %v1171_v14  ;;  %889 = vmatprep.subr.bf16.mxu0 %v1054_v15  ;;  %v105_v14 = vld [vmem:[#allocation2 + $0x210] sm:$0xff] }
  0x56   :  { %930 = vmatprep.subr.bf16.mxu1 %v1056_v16  ;;  %v109_v15 = vld [vmem:[#allocation2 + $0x230] sm:$0xff]  ;;  %v106_v16 = vld [vmem:[#allocation2 + $0x218] sm:$0xff] }
  0xa5   :  { %v31_v17 = vpop.xlane.xlu0 %30 }
  0xa6   :  { %vm32_vm0 = vcmp.gt.f32.partialorder %v31_v17, 0.0 }
  0xa7   :  { %v33_v21 = vsel %vm32_vm0, %v31_v17, 1.0  ;;  %v110_v17 = vld [vmem:[#allocation2 + $0x238] sm:$0xff] }
  0xa8   :  { %1181 = vrsqrt.f32 %v33_v21  ;;  %v1109_v21 = vcombine.low %v97_v6, %v101_v7  ;;  %v1119_v34 = vcombine.low %v106_v16, %v110_v17  ;;  %v161_v7 = vld [vmem:[#allocation2 + $0x3d0] sm:$0xff] }
  0xb2   :  { %v1182_v22 = vpop.eup %1181 }
  0xb3   :  { %v36_v24 = vmul.f32 %v1182_v22, %v1246_v1  ;;  %v35_v25 = vmul.f32 %v1182_v22, %v1241_v0  ;;  %v1061_v0 = vcombine.low %v49_v26, %v53_v29  ;;  %v1063_v1 = vcombine.low %v50_v30, %v54_v31  ;;  %v113_v26 = vld [vmem:[#allocation2 + $0x250] sm:$0xff]  ;;  %v114_v30 = vld [vmem:[#allocation2 + $0x258] sm:$0xff] }
  0xb4   :  { %v1111_v22 = vcombine.low %v98_v8, %v102_v9  ;;  %v117_v29 = vld [vmem:[#allocation2 + $0x270] sm:$0xff]  ;;  %v118_v31 = vld [vmem:[#allocation2 + $0x278] sm:$0xff] }
  0xb5   :  { %v38_v32 = vpack.c.bf16 %v36_v24, %v36_v24  ;;  %v1270_v33 = vpack.c.bf16 %v35_v25, %v35_v25  ;;  %v1118_v24 = vcombine.high %v105_v14, %v109_v15  ;;  %v1120_v25 = vcombine.high %v106_v16, %v110_v17  ;;  %v165_v8 = vld [vmem:[#allocation2 + $0x3f0] sm:$0xff]  ;;  %v162_v9 = vld [vmem:[#allocation2 + $0x3d8] sm:$0xff] }
  0xb6   :  { %v971_v17 = vlaneseq }
  0xb7   :  { %839 = vmatprep.mubr.bf16.mxu0 %v38_v32  ;;  %880 = vmatprep.mubr.bf16.mxu1 %v38_v32 }
  0xb8   :  { %840 = vmatmul.mubr.bf16.vlgmr.msra.gmra.mrb[0].mxu0 %v1270_v33  ;;  %881 = vmatmul.mubr.bf16.vlgmr.msra.gmra.mrb[0].mxu1 %v1270_v33 }
  0xb9   :  { %890 = vmatpush1.bf16.msra.mxu0 %v1053_v27  ;;  %931 = vmatpush1.bf16.msra.mxu1 %v1055_v28  ;;  %v73_v27 = vld [vmem:[#allocation2 + $0x110] sm:$0xff] }
  0xba   :  { %921 = vmatprep.mubr.bf16.mxu0 %v38_v32  ;;  %962 = vmatprep.mubr.bf16.mxu1 %v38_v32  ;;  %v77_v28 = vld [vmem:[#allocation2 + $0x130] sm:$0xff]  ;;  %v1117_v32 = vcombine.low %v105_v14, %v109_v15  ;;  %v1173_v15 = vcombine.low %v161_v7, %v165_v8 }
  0xbb   :  { %891 = vmatprep.subr.bf16.mxu0 %v1062_v35  ;;  %932 = vmatprep.subr.bf16.mxu1 %v1064_v36  ;;  %v1086_v50 = vcombine.high %v73_v27, %v77_v28  ;;  %v1085_v56 = vcombine.low %v73_v27, %v77_v28  ;;  %v1126_v35 = vcombine.high %v113_v26, %v117_v29  ;;  %v137_v28 = vld [vmem:[#allocation2 + $0x310] sm:$0xff] }
  0xbc   :  { %v1128_v36 = vcombine.high %v114_v30, %v118_v31 }
  0xbd   :  { %892 = vmatpush1.bf16.msra.mxu0 %v1061_v0  ;;  %933 = vmatpush1.bf16.msra.mxu1 %v1063_v1  ;;  %v126_v0 = vld [vmem:[#allocation2 + $0x2b8] sm:$0xff]  ;;  %v1125_v1 = vcombine.low %v113_v26, %v117_v29 }
  0xbe   :  { %893 = vmatprep.subr.bf16.mxu0 %v1070_v40  ;;  %934 = vmatprep.subr.bf16.mxu1 %v1072_v41  ;;  %v1127_v40 = vcombine.low %v114_v30, %v118_v31  ;;  %v1134_v41 = vcombine.high %v121_v37, %v125_v38  ;;  %v1136_v42 = vcombine.high %v122_v39, %v126_v0  ;;  %v1210_v30 = vmov -1.0  }
  0xc1   :  { %894 = vmatpush1.bf16.msra.mxu0 %v1069_v18  ;;  %935 = vmatpush1.bf16.msra.mxu1 %v1071_v19  ;;  %v134_v18 = vld [vmem:[#allocation2 + $0x2f8] sm:$0xff]  ;;  %v1133_v19 = vcombine.low %v121_v37, %v125_v38 }
  0xc2   :  { %895 = vmatprep.subr.bf16.mxu0 %v1078_v20  ;;  %936 = vmatprep.subr.bf16.mxu1 %v1080_v23  ;;  %v1135_v20 = vcombine.low %v122_v39, %v126_v0  ;;  %v1142_v23 = vcombine.high %v129_v43, %v133_v44  ;;  %v1144_v27 = vcombine.high %v130_v45, %v134_v18 }
  0xc5   :  { %896 = vmatpush1.bf16.msra.mxu0 %v1077_v48  ;;  %937 = vmatpush1.bf16.msra.mxu1 %v1079_v49  ;;  %v142_v48 = vld [vmem:[#allocation2 + $0x338] sm:$0xff]  ;;  %v1141_v49 = vcombine.low %v129_v43, %v133_v44 }
  0xc6   :  { %897 = vmatprep.subr.bf16.mxu0 %v1086_v50  ;;  %938 = vmatprep.subr.bf16.mxu1 %v1088_v51  ;;  %v1143_v50 = vcombine.low %v130_v45, %v134_v18  ;;  %v1150_v51 = vcombine.high %v137_v28, %v141_v46  ;;  %v1152_v52 = vcombine.high %v138_v47, %v142_v48 }
  0xc9   :  { %898 = vmatpush1.bf16.msra.mxu0 %v1085_v56  ;;  %939 = vmatpush1.bf16.msra.mxu1 %v1087_v57  ;;  %v150_v56 = vld [vmem:[#allocation2 + $0x378] sm:$0xff]  ;;  %v1149_v57 = vcombine.low %v137_v28, %v141_v46 }
  0xca   :  { %899 = vmatprep.subr.bf16.mxu0 %v1094_v58  ;;  %940 = vmatprep.subr.bf16.mxu1 %v1096_v59  ;;  %v1151_v58 = vcombine.low %v138_v47, %v142_v48  ;;  %v1158_v59 = vcombine.high %v145_v53, %v149_v54  ;;  %v1160_v60 = vcombine.high %v146_v55, %v150_v56 }
  0xcd   :  { %900 = vmatpush1.bf16.msra.mxu0 %v1093_v2  ;;  %941 = vmatpush1.bf16.msra.mxu1 %v1095_v3  ;;  %v158_v2 = vld [vmem:[#allocation2 + $0x3b8] sm:$0xff]  ;;  %v1157_v3 = vcombine.low %v145_v53, %v149_v54 }
  0xce   :  { %901 = vmatprep.subr.bf16.mxu0 %v1102_v4  ;;  %942 = vmatprep.subr.bf16.mxu1 %v1104_v5  ;;  %v1159_v4 = vcombine.low %v146_v55, %v150_v56  ;;  %v1166_v5 = vcombine.high %v153_v61, %v157_v62  ;;  %v1168_v6 = vcombine.high %v154_v63, %v158_v2 }
  0xd1   :  { %902 = vmatpush1.bf16.msra.mxu0 %v1101_v10  ;;  %943 = vmatpush1.bf16.msra.mxu1 %v1103_v11  ;;  %v166_v10 = vld [vmem:[#allocation2 + $0x3f8] sm:$0xff]  ;;  %v1165_v11 = vcombine.low %v153_v61, %v157_v62 }
  0xd2   :  { %903 = vmatprep.subr.bf16.mxu0 %v1110_v12  ;;  %944 = vmatprep.subr.bf16.mxu1 %v1112_v13  ;;  %v1167_v12 = vcombine.low %v154_v63, %v158_v2  ;;  %v1174_v13 = vcombine.high %v161_v7, %v165_v8  ;;  %v1176_v14 = vcombine.high %v162_v9, %v166_v10 }
  0xd3   :  { %v1175_v16 = vcombine.low %v162_v9, %v166_v10 }
  0xd5   :  { %904 = vmatpush1.bf16.msra.mxu0 %v1109_v21  ;;  %945 = vmatpush1.bf16.msra.mxu1 %v1111_v22  ;;  %v1282_v21 = vand.u32 127, %v971_v17 }
  0xd6   :  { %905 = vmatprep.subr.bf16.mxu0 %v1118_v24  ;;  %946 = vmatprep.subr.bf16.mxu1 %v1120_v25 }
  0xd7   :  { %v973_v22 = vadd.s32 128, %v1282_v21  ;;  %v974_v24 = vand.u32 1, %v1282_v21  ;;  %v980_v25 = vand.u32 2, %v1282_v21  ;;  %vm1028_vm5 = vcmp.eq.s32.totalorder %v1282_v21, 0 }
  0xd8   :  { %vm1030_vm6 = vcmp.eq.s32.totalorder %v1282_v21, 2  ;;  %vm1032_vm7 = vcmp.eq.s32.totalorder %v1282_v21, 3  ;;  %vm1034_vm8 = vcmp.eq.s32.totalorder %v1282_v21, 5  ;;  %vm1036_vm9 = vcmp.eq.s32.totalorder %v1282_v21, 6 }
  0xd9   :  { %906 = vmatpush1.bf16.msra.mxu0 %v1117_v32  ;;  %947 = vmatpush1.bf16.msra.mxu1 %v1119_v34  ;;  %v975_v26 = vand.u32 1, %v973_v22  ;;  %v981_v29 = vand.u32 2, %v973_v22  ;;  %vm976_vm1 = vcmp.eq.s32.totalorder %v974_v24, 0  ;;  %vm982_vm2 = vcmp.eq.s32.totalorder %v980_v25, 0 }
  0xda   :  { %907 = vmatprep.subr.bf16.mxu0 %v1126_v35  ;;  %948 = vmatprep.subr.bf16.mxu1 %v1128_v36  ;;  %v978_v31 = vsel %vm976_vm1, 1.0, %v1210_v30  ;;  %v984_v32 = vsel %vm982_vm2, 1.0, %v1210_v30  ;;  %vm1038_vm10 = vcmp.eq.s32.totalorder %v1282_v21, 7  ;;  %vm1040_vm11 = vcmp.eq.s32.totalorder %v1282_v21, 8 }
  0xdb   :  { %vm977_vm3 = vcmp.eq.s32.totalorder %v975_v26, 0  ;;  %vm983_vm4 = vcmp.eq.s32.totalorder %v981_v29, 0 }
  0xdc   :  { %v979_v34 = vsel %vm977_vm3, 1.0, %v1210_v30 }
  0xdd   :  { %908 = vmatpush1.bf16.msra.mxu0 %v1125_v1  ;;  %949 = vmatpush1.bf16.msra.mxu1 %v1127_v40  ;;  %v986_v1 = vmul.f32 %v984_v32, %v978_v31 }
  0xde   :  { %909 = vmatprep.subr.bf16.mxu0 %v1134_v41  ;;  %950 = vmatprep.subr.bf16.mxu1 %v1136_v42 }
  0xe1   :  { %910 = vmatpush1.bf16.msra.mxu0 %v1133_v19  ;;  %951 = vmatpush1.bf16.msra.mxu1 %v1135_v20 }
  0xe2   :  { %911 = vmatprep.subr.bf16.mxu0 %v1142_v23  ;;  %952 = vmatprep.subr.bf16.mxu1 %v1144_v27 }
  0xe5   :  { %912 = vmatpush1.bf16.msra.mxu0 %v1141_v49  ;;  %953 = vmatpush1.bf16.msra.mxu1 %v1143_v50 }
  0xe6   :  { %913 = vmatprep.subr.bf16.mxu0 %v1150_v51  ;;  %954 = vmatprep.subr.bf16.mxu1 %v1152_v52 }
  0xe9   :  { %914 = vmatpush1.bf16.msra.mxu0 %v1149_v57  ;;  %955 = vmatpush1.bf16.msra.mxu1 %v1151_v58 }
  0xea   :  { %915 = vmatprep.subr.bf16.mxu0 %v1158_v59  ;;  %956 = vmatprep.subr.bf16.mxu1 %v1160_v60 }
  0xed   :  { %916 = vmatpush1.bf16.msra.mxu0 %v1157_v3  ;;  %957 = vmatpush1.bf16.msra.mxu1 %v1159_v4 }
  0xee   :  { %917 = vmatprep.subr.bf16.mxu0 %v1166_v5  ;;  %958 = vmatprep.subr.bf16.mxu1 %v1168_v6 }
  0xf1   :  { %918 = vmatpush1.bf16.msra.mxu0 %v1165_v11  ;;  %959 = vmatpush1.bf16.msra.mxu1 %v1167_v12 }
  0xf2   :  { %919 = vmatprep.subr.bf16.mxu0 %v1174_v13  ;;  %960 = vmatprep.subr.bf16.mxu1 %v1176_v14 }
  0xf5   :  { %920 = vmatpush1.bf16.msra.mxu0 %v1173_v15  ;;  %961 = vmatpush1.bf16.msra.mxu1 %v1175_v16 }
  0xf8   :  { %922 = vmatmul.mubr.bf16.vlgmr.msra.gmra.mrb[4].mxu0 %v1270_v33  ;;  %963 = vmatmul.mubr.bf16.vlgmr.msra.gmra.mrb[4].mxu1 %v1270_v33  ;;  %v985_v33 = vsel %vm983_vm4, 1.0, %v1210_v30 }
  0xf9   :  { %v987_v44 = vmul.f32 %v985_v33, %v979_v34 }
 0x18b   :  { %v841_v35 = vpop.f32.mrb[0].mxu0  ;;  %v882_v36 = vpop.f32.mrb[0].mxu1 }
 0x18c   :  { %v1000_v37 = vmul.f32 %v882_v36, %v841_v35  ;;  %v843_v38 = vpop.f32.mrb[1].mxu0  ;;  %v884_v39 = vpop.f32.mrb[1].mxu1  ;;  %v988_v0 = vmul.f32 %v841_v35, %v841_v35  ;;  %v1015_v51 = vmul.f32 %v986_v1, %v841_v35 }
 0x18d   :  { %v1001_v40 = vmul.f32 %v884_v39, %v843_v38  ;;  %v845_v41 = vpop.f32.mrb[2].mxu0  ;;  %v886_v42 = vpop.f32.mrb[2].mxu1  ;;  %v989_v43 = vmul.f32 %v843_v38, %v843_v38  ;;  %v1016_v54 = vmul.f32 %v987_v44, %v843_v38 }
 0x18e   :  { %v846_v45 = vpop.f32.mrb[3].mxu0  ;;  %v887_v18 = vpop.f32.mrb[3].mxu1  ;;  %v1005_v19 = vmul.f32 %v988_v0, %v978_v31  ;;  %v995_v20 = vmul.f32 %v988_v0, %v984_v32  ;;  %v1023_v23 = vmul.f32 %v988_v0, %v986_v1 }
 0x18f   :  { %v1002_v27 = vadd.f32 %v1001_v40, %v1000_v37  ;;  %v1006_v28 = vmul.f32 %v989_v43, %v979_v34  ;;  %v996_v46 = vmul.f32 %v989_v43, %v985_v33  ;;  %v1024_v47 = vmul.f32 %v989_v43, %v987_v44 }
 0x191   :  { %1003 = vadd.xlane.f32.xlu1 %v1002_v27  ;;  %v1007_v48 = vadd.f32 %v1006_v28, %v1005_v19  ;;  %v997_v49 = vadd.f32 %v996_v46, %v995_v20  ;;  %v1025_v50 = vadd.f32 %v1024_v47, %v1023_v23 }
 0x193   :  { %1008 = vadd.xlane.f32.xlu0 %v1007_v48 }
 0x195   :  { %998 = vadd.xlane.f32.xlu1 %v997_v49 }
 0x1cb   :  { %v923_v52 = vpop.f32.mrb[4].mxu0  ;;  %v964_v53 = vpop.f32.mrb[4].mxu1 }
 0x1cc   :  { %v990_v55 = vmul.f32 %v923_v52, %v841_v35  ;;  %v1010_v56 = vmul.f32 %v964_v53, %v841_v35  ;;  %v1017_v57 = vmul.f32 %v1015_v51, %v964_v53  ;;  %v925_v58 = vpop.f32.mrb[5].mxu0  ;;  %v966_v59 = vpop.f32.mrb[5].mxu1 }
 0x1cd   :  { %v991_v60 = vmul.f32 %v925_v58, %v843_v38  ;;  %v1011_v61 = vmul.f32 %v966_v59, %v843_v38  ;;  %v1018_v62 = vmul.f32 %v1016_v54, %v966_v59  ;;  %v927_v63 = vpop.f32.mrb[6].mxu0  ;;  %v968_v2 = vpop.f32.mrb[6].mxu1 }
 0x1ce   :  { %v928_v3 = vpop.f32.mrb[7].mxu0  ;;  %v969_v4 = vpop.f32.mrb[7].mxu1 }
 0x1cf   :  { %v1019_v5 = vadd.f32 %v1018_v62, %v1017_v57  ;;  %v992_v6 = vadd.f32 %v991_v60, %v990_v55  ;;  %v1012_v7 = vadd.f32 %v1011_v61, %v1010_v56 }
 0x1d1   :  { %1020 = vadd.xlane.f32.xlu1 %v1019_v5  ;;  %993 = vadd.xlane.f32.xlu0 %v992_v6 }
 0x1d5   :  { %1026 = vadd.xlane.f32.xlu1 %v1025_v50  ;;  %1013 = vadd.xlane.f32.xlu0 %v1012_v7 }
 0x21e   :  { %v1004_v8 = vpop.xlane.xlu1 %1003 }
 0x220   :  { %v1009_v9 = vpop.xlane.xlu0 %1008 }
 0x222   :  { %v999_v10 = vpop.xlane.xlu1 %998 }
 0x25e   :  { %v1021_v11 = vpop.xlane.xlu1 %1020  ;;  %v994_v12 = vpop.xlane.xlu0 %993 }
 0x25f   :  { %v1029_v13 = vsel %vm1028_vm5, %v994_v12, 0.0  ;;  %v1022_v16 = vsub.f32 0.0, %v1021_v11 }
 0x260   :  { %v1031_v14 = vsel %vm1030_vm6, %v999_v10, %v1029_v13 }
 0x261   :  { %v1033_v15 = vsel %vm1032_vm7, %v1004_v8, %v1031_v14 }
 0x262   :  { %v1035_v17 = vsel %vm1034_vm8, %v1009_v9, %v1033_v15  ;;  %v1014_v22 = vpop.xlane.xlu0 %1013  ;;  %v1027_v25 = vpop.xlane.xlu1 %1026 }
 0x263   :  { %v1037_v24 = vsel %vm1036_vm9, %v1014_v22, %v1035_v17 }
 0x264   :  { %v1039_v26 = vsel %vm1038_vm10, %v1022_v16, %v1037_v24 }
 0x265   :  { %v1041_v29 = vsel %vm1040_vm11, %v1027_v25, %v1039_v26 }
 0x266   :  { %1043 = vst.msk [vmem:[%s1299_s2] sm:$0xff] %vm1042_vm12, %v1041_v29 }
 0x267   :  { %1048 = vsyncpa [#allocation3], 1 }

</bundles_post_ra>
